<compile_context>
chip_gen: v5e
topology: v5e:2x2
jax: 0.10.0
libtpu: 0.0.40
codegen_flags: <defaults>
</compile_context>

<pallas_src>
import jax
import jax.numpy as jnp
from jax.experimental import pallas as pl
from jax.experimental.pallas import tpu as pltpu


def se_basic_block_kernel(x_ref, w1_ref, bn1s_ref, bn1b_ref,
                          w2_ref, bn2s_ref, bn2b_ref,
                          wse1_ref, wse2_ref, out_ref, pad_ref):
    # x_ref   : (NB, H, W*C) f32        lane-dense view (W*C = 128)
    # w{1,2}  : (3*W*C, W*C) bf16       block-Toeplitz conv matrices
    # bn*     : (1, W*C) f32            per-channel scale/bias tiled over W
    # wse1    : (W*C, C//8) f32         fc1 with GAP-over-W and 1/(H*W) folded in
    # wse2    : (C//8, W*C) f32         fc2 tiled over W (gate returns W-tiled)
    # pad_ref : (NB, H+2, W*C) f32      H-padded scratch for both convs
    NB, H, WC = x_ref.shape
    M = NB * H

    x = x_ref[...]                                         # (NB, H, WC) f32

    # Zero only the H-padding border rows; the interior is fully overwritten
    # before each conv, so the border stays zero for the whole body.
    zrow = jnp.zeros((NB, 1, WC), jnp.float32)
    pad_ref[:, 0:1, :] = zrow
    pad_ref[:, H + 1:H + 2, :] = zrow

    def conv3x3(inp, w_ref):
        # One MXU matmul: (M, 3*WC) @ (3*WC, WC), f32 accumulate.  The three
        # H-shifted row views are lane-concatenated at vreg-aligned offsets
        # (0, WC, 2*WC); dx shift + W padding are inside w_ref's band structure.
        pad_ref[:, 1:H + 1, :] = inp
        patches = jnp.concatenate(
            [pad_ref[:, dy:dy + H, :] for dy in range(3)], axis=-1)
        return jnp.dot(
            patches.reshape(M, 3 * WC).astype(jnp.bfloat16), w_ref[...],
            preferred_element_type=jnp.float32).reshape(NB, H, WC)

    # ---- conv1 -> BN1 -> ReLU ----
    o = conv3x3(x, w1_ref)
    o = jnp.maximum(o * bn1s_ref[...] + bn1b_ref[...], 0.0)

    # ---- conv2 -> BN2 ----
    o = conv3x3(o, w2_ref)
    o = o * bn2s_ref[...] + bn2b_ref[...]

    # ---- SE: GAP -> fc1 -> ReLU -> fc2 -> sigmoid ----
    ssum = jnp.sum(o, axis=1)                               # (NB, WC), sum over H
    h = jnp.maximum(jnp.dot(ssum, wse1_ref[...],
                            preferred_element_type=jnp.float32), 0.0)   # (NB, Cr)
    z = jnp.dot(h, wse2_ref[...],
                preferred_element_type=jnp.float32)         # (NB, WC), W-tiled
    gate = pl.reciprocal(1.0 + jnp.exp(-z), approx=True)    # sigmoid on the EUP

    # ---- SE scale + identity shortcut + ReLU ----
    out_ref[...] = jnp.maximum(o * gate[:, None, :] + x, 0.0)


def _block_toeplitz(w_hwio, W):
    """(3, 3, C, C) HWIO conv kernel -> (3*W*C, W*C) block-Toeplitz matrix.

    Row index = dy*(W*C) + wi*C + ci, column index = wo*C + co.  The block at
    (wi, wo) is w[dy, dx] when wi == wo + dx - 1 (same-size conv; zero padding
    along W is handled by the band structure, along H by the padded scratch).
    """
    blocks = []
    for dy in range(3):
        t = sum(jnp.einsum('ij,co->icjo',
                           jnp.eye(W, k=1 - dx, dtype=w_hwio.dtype),
                           w_hwio[dy, dx])
                for dx in range(3))
        blocks.append(t.reshape(W * w_hwio.shape[2], W * w_hwio.shape[3]))
    return jnp.concatenate(blocks, axis=0)


def se_basic_block(x, p):
    """x: (N, H, W, C) float32 NHWC.  Identity-shortcut SEBasicBlock forward."""
    N, H, W, C = x.shape
    WC = W * C
    Cr = p['wse1'].shape[1]

    # Images per grid step: target M = NB*H ~ 128 matmul rows, capped at N.
    NB = min(N, max(1, 128 // H))
    while N % NB:
        NB -= 1

    # Host-side weight prep (in a real model these would be precomputed once).
    w1t = _block_toeplitz(p['w1_hwio'], W).astype(jnp.bfloat16)   # (3*WC, WC)
    w2t = _block_toeplitz(p['w2_hwio'], W).astype(jnp.bfloat16)
    bn1s = jnp.tile(p['bn1s'].reshape(1, C), (1, W))              # (1, WC)
    bn1b = jnp.tile(p['bn1b'].reshape(1, C), (1, W))
    bn2s = jnp.tile(p['bn2s'].reshape(1, C), (1, W))
    bn2b = jnp.tile(p['bn2b'].reshape(1, C), (1, W))
    wse1t = jnp.tile(p['wse1'], (W, 1)) / float(H * W)            # (WC, Cr)
    wse2t = jnp.tile(p['wse2'], (1, W))                           # (Cr, WC)

    x_flat = x.reshape(N, H, WC)    # same bytes: lane-dense view of NHWC

    out = pl.pallas_call(
        se_basic_block_kernel,
        out_shape=jax.ShapeDtypeStruct((N, H, WC), jnp.float32),
        grid_spec=pltpu.PrefetchScalarGridSpec(
            num_scalar_prefetch=0,
            grid=(N // NB,),
            in_specs=[
                pl.BlockSpec((NB, H, WC), lambda n: (n, 0, 0)),
                pl.BlockSpec((3 * WC, WC), lambda n: (0, 0)),
                pl.BlockSpec((1, WC), lambda n: (0, 0)),
                pl.BlockSpec((1, WC), lambda n: (0, 0)),
                pl.BlockSpec((3 * WC, WC), lambda n: (0, 0)),
                pl.BlockSpec((1, WC), lambda n: (0, 0)),
                pl.BlockSpec((1, WC), lambda n: (0, 0)),
                pl.BlockSpec((WC, Cr), lambda n: (0, 0)),
                pl.BlockSpec((Cr, WC), lambda n: (0, 0)),
            ],
            out_specs=pl.BlockSpec((NB, H, WC), lambda n: (n, 0, 0)),
            scratch_shapes=[pltpu.VMEM((NB, H + 2, WC), jnp.float32)],
        ),
        compiler_params=pltpu.CompilerParams(
            dimension_semantics=("parallel",)),
    )(x_flat, w1t, bn1s, bn1b, w2t, bn2s, bn2b, wse1t, wse2t)

    return out.reshape(N, H, W, C)


# ----------------------------- reference (plain JAX) ------------------------
def _conv3x3_ref(x, w_hwio):
    # bf16 operands, f32 accumulation -- matches the kernel's matmul precision.
    N, H, W, _ = x.shape
    xb = jnp.pad(x.astype(jnp.bfloat16), ((0, 0), (1, 1), (1, 1), (0, 0)))
    wb = w_hwio.astype(jnp.bfloat16)
    out = jnp.zeros((N, H, W, w_hwio.shape[-1]), jnp.float32)
    for dy in range(3):
        for dx in range(3):
            out = out + jnp.einsum('nhwc,co->nhwo',
                                   xb[:, dy:dy + H, dx:dx + W, :], wb[dy, dx],
                                   preferred_element_type=jnp.float32)
    return out


def ref_forward(x, p):
    out = jnp.maximum(_conv3x3_ref(x, p['w1_hwio']) * p['bn1s'] + p['bn1b'], 0.0)
    out = _conv3x3_ref(out, p['w2_hwio']) * p['bn2s'] + p['bn2b']
    s = out.mean(axis=(1, 2), keepdims=True)                        # (N,1,1,C)
    h = jnp.maximum(jnp.einsum('nijc,cr->nijr', s, p['wse1']), 0.0)
    g = jax.nn.sigmoid(jnp.einsum('nijr,rc->nijc', h, p['wse2']))
    return jnp.maximum(out * g + x, 0.0)


def make_params(key, C, reduction=8, eps=1e-5):
    ks = jax.random.split(key, 10)
    Cr = C // reduction
    w1_hwio = jax.random.normal(ks[0], (3, 3, C, C), jnp.float32) * 0.1
    w2_hwio = jax.random.normal(ks[1], (3, 3, C, C), jnp.float32) * 0.1
    wse1 = jax.random.normal(ks[2], (C, Cr), jnp.float32) * 0.2
    wse2 = jax.random.normal(ks[3], (Cr, C), jnp.float32) * 0.2

    def bn(kg, kb, km, kv):
        gamma = 1.0 + 0.1 * jax.random.normal(kg, (C,), jnp.float32)
        beta = 0.1 * jax.random.normal(kb, (C,), jnp.float32)
        mean = 0.1 * jax.random.normal(km, (C,), jnp.float32)
        var = 0.5 + jnp.abs(jax.random.normal(kv, (C,), jnp.float32))
        scale = gamma / jnp.sqrt(var + eps)
        bias = beta - mean * scale
        return scale.reshape(1, C), bias.reshape(1, C)

    bn1s, bn1b = bn(ks[4], ks[5], ks[6], ks[7])
    bn2s, bn2b = bn(ks[8], ks[9], ks[4], ks[5])

    return {'w1_hwio': w1_hwio, 'w2_hwio': w2_hwio,
            'bn1s': bn1s, 'bn1b': bn1b, 'bn2s': bn2s, 'bn2b': bn2b,
            'wse1': wse1, 'wse2': wse2}


if __name__ == "__main__":
    key = jax.random.PRNGKey(0)
    kx, kp = jax.random.split(key)

    N, H, W, C = 2, 8, 8, 16          # SE reduction=8 -> hidden dim 2
    x = jax.random.normal(kx, (N, H, W, C), jnp.float32)
    params = make_params(kp, C, reduction=8)

    out = jax.block_until_ready(se_basic_block(x, params))
    ref = jax.block_until_ready(ref_forward(x, params))

    assert out.shape == (N, H, W, C)
    err = jnp.max(jnp.abs(out - ref))
    # Tolerance covers bf16-matmul rounding + approx-reciprocal sigmoid gate.
    assert jnp.allclose(out, ref, atol=5e-2, rtol=5e-2), f"max abs err {err}"

    print("KERNEL_OK")
</pallas_src>

<mosaic_0001>
module attributes {stable_mosaic.version = 11 : i64} {
  func.func @se_basic_block_kernel(%arg0: i32, %arg1: memref<2x8x128xf32, #tpu.memory_space<vmem>>, %arg2: memref<384x128xbf16, #tpu.memory_space<vmem>>, %arg3: memref<1x128xf32, #tpu.memory_space<vmem>>, %arg4: memref<1x128xf32, #tpu.memory_space<vmem>>, %arg5: memref<384x128xbf16, #tpu.memory_space<vmem>>, %arg6: memref<1x128xf32, #tpu.memory_space<vmem>>, %arg7: memref<1x128xf32, #tpu.memory_space<vmem>>, %arg8: memref<128x2xf32, #tpu.memory_space<vmem>>, %arg9: memref<2x128xf32, #tpu.memory_space<vmem>>, %arg10: memref<2x8x128xf32, #tpu.memory_space<vmem>>, %arg11: memref<2x10x128xf32, #tpu.memory_space<vmem>>) attributes {dimension_semantics = [#tpu.dimension_semantics<parallel>], iteration_bounds = array<i64: 1>, scalar_prefetch = 0 : i64, scratch_operands = 1 : i64, tpu.core_type = #tpu.core_type<tc>, window_params = [{transform_indices = @transform_0, window_bounds = array<i64: 2, 8, 128>}, {pipeline_mode = #tpu.pipeline_mode<synchronous>, transform_indices = @transform_1, window_bounds = array<i64: 384, 128>}, {pipeline_mode = #tpu.pipeline_mode<synchronous>, transform_indices = @transform_2, window_bounds = array<i64: 1, 128>}, {pipeline_mode = #tpu.pipeline_mode<synchronous>, transform_indices = @transform_3, window_bounds = array<i64: 1, 128>}, {pipeline_mode = #tpu.pipeline_mode<synchronous>, transform_indices = @transform_4, window_bounds = array<i64: 384, 128>}, {pipeline_mode = #tpu.pipeline_mode<synchronous>, transform_indices = @transform_5, window_bounds = array<i64: 1, 128>}, {pipeline_mode = #tpu.pipeline_mode<synchronous>, transform_indices = @transform_6, window_bounds = array<i64: 1, 128>}, {pipeline_mode = #tpu.pipeline_mode<synchronous>, transform_indices = @transform_7, window_bounds = array<i64: 128, 2>}, {pipeline_mode = #tpu.pipeline_mode<synchronous>, transform_indices = @transform_8, window_bounds = array<i64: 2, 128>}, {transform_indices = @transform_9, window_bounds = array<i64: 2, 8, 128>}]} {
    %c0 = arith.constant 0 : index
    %c0_0 = arith.constant 0 : index
    %c0_1 = arith.constant 0 : index
    %0 = vector.load %arg1[%c0, %c0_0, %c0_1] : memref<2x8x128xf32, #tpu.memory_space<vmem>>, vector<2x8x128xf32>
    %cst = arith.constant 0.000000e+00 : f32
    %1 = vector.broadcast %cst : f32 to vector<2x1x128xf32>
    %c0_2 = arith.constant 0 : index
    %c0_3 = arith.constant 0 : index
    %c0_4 = arith.constant 0 : index
    %2 = vector.load %arg11[%c0_2, %c0_3, %c0_4] : memref<2x10x128xf32, #tpu.memory_space<vmem>>, vector<2x1x128xf32>
    tpu.vector_store %arg11[%c0_2, %c0_3, %c0_4], %1 {strides = array<i32>} : memref<2x10x128xf32, #tpu.memory_space<vmem>>, vector<2x1x128xf32>,
    %c0_5 = arith.constant 0 : index
    %c9 = arith.constant 9 : index
    %c0_6 = arith.constant 0 : index
    %3 = vector.load %arg11[%c0_5, %c9, %c0_6] : memref<2x10x128xf32, #tpu.memory_space<vmem>>, vector<2x1x128xf32>
    tpu.vector_store %arg11[%c0_5, %c9, %c0_6], %1 {strides = array<i32>} : memref<2x10x128xf32, #tpu.memory_space<vmem>>, vector<2x1x128xf32>,
    %c0_7 = arith.constant 0 : index
    %c1 = arith.constant 1 : index
    %c0_8 = arith.constant 0 : index
    %4 = vector.load %arg11[%c0_7, %c1, %c0_8] : memref<2x10x128xf32, #tpu.memory_space<vmem>>, vector<2x8x128xf32>
    tpu.vector_store %arg11[%c0_7, %c1, %c0_8], %0 {strides = array<i32>} : memref<2x10x128xf32, #tpu.memory_space<vmem>>, vector<2x8x128xf32>,
    %c0_9 = arith.constant 0 : index
    %c0_10 = arith.constant 0 : index
    %c0_11 = arith.constant 0 : index
    %5 = vector.load %arg11[%c0_9, %c0_10, %c0_11] : memref<2x10x128xf32, #tpu.memory_space<vmem>>, vector<2x8x128xf32>
    %c0_12 = arith.constant 0 : index
    %c1_13 = arith.constant 1 : index
    %c0_14 = arith.constant 0 : index
    %6 = vector.load %arg11[%c0_12, %c1_13, %c0_14] : memref<2x10x128xf32, #tpu.memory_space<vmem>>, vector<2x8x128xf32>
    %c0_15 = arith.constant 0 : index
    %c2 = arith.constant 2 : index
    %c0_16 = arith.constant 0 : index
    %7 = vector.load %arg11[%c0_15, %c2, %c0_16] : memref<2x10x128xf32, #tpu.memory_space<vmem>>, vector<2x8x128xf32>
    %8 = tpu.concatenate %5, %6, %7 in 2 : vector<2x8x128xf32>, vector<2x8x128xf32>, vector<2x8x128xf32> -> vector<2x8x384xf32>
    %9 = vector.shape_cast %8 : vector<2x8x384xf32> to vector<16x384xf32>
    %10 = arith.truncf %9 : vector<16x384xf32> to vector<16x384xbf16>
    %c0_17 = arith.constant 0 : index
    %c0_18 = arith.constant 0 : index
    %11 = vector.load %arg2[%c0_17, %c0_18] : memref<384x128xbf16, #tpu.memory_space<vmem>>, vector<384x128xbf16>
    %cst_19 = arith.constant dense<0.000000e+00> : vector<16x128xf32>
    %12 = tpu.matmul %10, %11, %cst_19 {dimension_numbers = #tpu.dot_dimension_numbers<[1], [0], [0], [1], [0, 0, 1, 1], [], []>} : vector<16x384xbf16>, vector<384x128xbf16>, vector<16x128xf32> -> vector<16x128xf32>
    %13 = vector.shape_cast %12 : vector<16x128xf32> to vector<2x8x128xf32>
    %c0_20 = arith.constant 0 : index
    %c0_21 = arith.constant 0 : index
    %14 = vector.load %arg3[%c0_20, %c0_21] : memref<1x128xf32, #tpu.memory_space<vmem>>, vector<1x128xf32>
    %15 = vector.shape_cast %14 : vector<1x128xf32> to vector<1x1x128xf32>
    %16 = vector.broadcast %15 : vector<1x1x128xf32> to vector<2x8x128xf32>
    %17 = arith.mulf %13, %16 : vector<2x8x128xf32>
    %c0_22 = arith.constant 0 : index
    %c0_23 = arith.constant 0 : index
    %18 = vector.load %arg4[%c0_22, %c0_23] : memref<1x128xf32, #tpu.memory_space<vmem>>, vector<1x128xf32>
    %19 = vector.shape_cast %18 : vector<1x128xf32> to vector<1x1x128xf32>
    %20 = vector.broadcast %19 : vector<1x1x128xf32> to vector<2x8x128xf32>
    %21 = arith.addf %17, %20 : vector<2x8x128xf32>
    %cst_24 = arith.constant 0.000000e+00 : f32
    %22 = vector.broadcast %cst_24 : f32 to vector<2x8x128xf32>
    %23 = arith.maximumf %21, %22 : vector<2x8x128xf32>
    %c0_25 = arith.constant 0 : index
    %c1_26 = arith.constant 1 : index
    %c0_27 = arith.constant 0 : index
    %24 = vector.load %arg11[%c0_25, %c1_26, %c0_27] : memref<2x10x128xf32, #tpu.memory_space<vmem>>, vector<2x8x128xf32>
    tpu.vector_store %arg11[%c0_25, %c1_26, %c0_27], %23 {strides = array<i32>} : memref<2x10x128xf32, #tpu.memory_space<vmem>>, vector<2x8x128xf32>,
    %c0_28 = arith.constant 0 : index
    %c0_29 = arith.constant 0 : index
    %c0_30 = arith.constant 0 : index
    %25 = vector.load %arg11[%c0_28, %c0_29, %c0_30] : memref<2x10x128xf32, #tpu.memory_space<vmem>>, vector<2x8x128xf32>
    %c0_31 = arith.constant 0 : index
    %c1_32 = arith.constant 1 : index
    %c0_33 = arith.constant 0 : index
    %26 = vector.load %arg11[%c0_31, %c1_32, %c0_33] : memref<2x10x128xf32, #tpu.memory_space<vmem>>, vector<2x8x128xf32>
    %c0_34 = arith.constant 0 : index
    %c2_35 = arith.constant 2 : index
    %c0_36 = arith.constant 0 : index
    %27 = vector.load %arg11[%c0_34, %c2_35, %c0_36] : memref<2x10x128xf32, #tpu.memory_space<vmem>>, vector<2x8x128xf32>
    %28 = tpu.concatenate %25, %26, %27 in 2 : vector<2x8x128xf32>, vector<2x8x128xf32>, vector<2x8x128xf32> -> vector<2x8x384xf32>
    %29 = vector.shape_cast %28 : vector<2x8x384xf32> to vector<16x384xf32>
    %30 = arith.truncf %29 : vector<16x384xf32> to vector<16x384xbf16>
    %c0_37 = arith.constant 0 : index
    %c0_38 = arith.constant 0 : index
    %31 = vector.load %arg5[%c0_37, %c0_38] : memref<384x128xbf16, #tpu.memory_space<vmem>>, vector<384x128xbf16>
    %cst_39 = arith.constant dense<0.000000e+00> : vector<16x128xf32>
    %32 = tpu.matmul %30, %31, %cst_39 {dimension_numbers = #tpu.dot_dimension_numbers<[1], [0], [0], [1], [0, 0, 1, 1], [], []>} : vector<16x384xbf16>, vector<384x128xbf16>, vector<16x128xf32> -> vector<16x128xf32>
    %33 = vector.shape_cast %32 : vector<16x128xf32> to vector<2x8x128xf32>
    %c0_40 = arith.constant 0 : index
    %c0_41 = arith.constant 0 : index
    %34 = vector.load %arg6[%c0_40, %c0_41] : memref<1x128xf32, #tpu.memory_space<vmem>>, vector<1x128xf32>
    %35 = vector.shape_cast %34 : vector<1x128xf32> to vector<1x1x128xf32>
    %36 = vector.broadcast %35 : vector<1x1x128xf32> to vector<2x8x128xf32>
    %37 = arith.mulf %33, %36 : vector<2x8x128xf32>
    %c0_42 = arith.constant 0 : index
    %c0_43 = arith.constant 0 : index
    %38 = vector.load %arg7[%c0_42, %c0_43] : memref<1x128xf32, #tpu.memory_space<vmem>>, vector<1x128xf32>
    %39 = vector.shape_cast %38 : vector<1x128xf32> to vector<1x1x128xf32>
    %40 = vector.broadcast %39 : vector<1x1x128xf32> to vector<2x8x128xf32>
    %41 = arith.addf %37, %40 : vector<2x8x128xf32>
    %cst_44 = arith.constant dense<0.000000e+00> : vector<2x128xf32>
    %42 = vector.multi_reduction <add>, %41, %cst_44 [1] : vector<2x8x128xf32> to vector<2x128xf32>
    %c0_45 = arith.constant 0 : index
    %c0_46 = arith.constant 0 : index
    %43 = vector.load %arg8[%c0_45, %c0_46] : memref<128x2xf32, #tpu.memory_space<vmem>>, vector<128x2xf32>
    %cst_47 = arith.constant dense<0.000000e+00> : vector<2x2xf32>
    %44 = tpu.matmul %42, %43, %cst_47 {dimension_numbers = #tpu.dot_dimension_numbers<[1], [0], [0], [1], [0, 0, 1, 1], [], []>} : vector<2x128xf32>, vector<128x2xf32>, vector<2x2xf32> -> vector<2x2xf32>
    %cst_48 = arith.constant 0.000000e+00 : f32
    %45 = vector.broadcast %cst_48 : f32 to vector<2x2xf32>
    %46 = arith.maximumf %44, %45 : vector<2x2xf32>
    %c0_49 = arith.constant 0 : index
    %c0_50 = arith.constant 0 : index
    %47 = vector.load %arg9[%c0_49, %c0_50] : memref<2x128xf32, #tpu.memory_space<vmem>>, vector<2x128xf32>
    %cst_51 = arith.constant dense<0.000000e+00> : vector<2x128xf32>
    %48 = tpu.matmul %46, %47, %cst_51 {dimension_numbers = #tpu.dot_dimension_numbers<[1], [0], [0], [1], [0, 0, 1, 1], [], []>} : vector<2x2xf32>, vector<2x128xf32>, vector<2x128xf32> -> vector<2x128xf32>
    %cst_52 = arith.constant 0.000000e+00 : f32
    %49 = vector.broadcast %cst_52 : f32 to vector<2x128xf32>
    %50 = arith.subf %49, %48 : vector<2x128xf32>
    %51 = math.exp %50 : vector<2x128xf32>
    %cst_53 = arith.constant 1.000000e+00 : f32
    %52 = vector.broadcast %cst_53 : f32 to vector<2x128xf32>
    %53 = arith.addf %52, %51 : vector<2x128xf32>
    %54 = tpu.reciprocal %53 {approx = true} : vector<2x128xf32> -> vector<2x128xf32>
    %55 = vector.shape_cast %54 : vector<2x128xf32> to vector<2x1x128xf32>
    %56 = vector.broadcast %55 : vector<2x1x128xf32> to vector<2x8x128xf32>
    %57 = arith.mulf %41, %56 : vector<2x8x128xf32>
    %58 = arith.addf %57, %0 : vector<2x8x128xf32>
    %cst_54 = arith.constant 0.000000e+00 : f32
    %59 = vector.broadcast %cst_54 : f32 to vector<2x8x128xf32>
    %60 = arith.maximumf %58, %59 : vector<2x8x128xf32>
    %c0_55 = arith.constant 0 : index
    %c0_56 = arith.constant 0 : index
    %c0_57 = arith.constant 0 : index
    %61 = vector.load %arg10[%c0_55, %c0_56, %c0_57] : memref<2x8x128xf32, #tpu.memory_space<vmem>>, vector<2x8x128xf32>
    tpu.vector_store %arg10[%c0_55, %c0_56, %c0_57], %60 {strides = array<i32>} : memref<2x8x128xf32, #tpu.memory_space<vmem>>, vector<2x8x128xf32>,
    return
  }
  func.func @transform_0(%arg0: i32) -> (i32, i32, i32) {
    %c0_i32 = arith.constant 0 : i32
    %c0_i32_0 = arith.constant 0 : i32
    %c0_i32_1 = arith.constant 0 : i32
    return %arg0, %c0_i32, %c0_i32_0 : i32, i32, i32
  }
  func.func @transform_1(%arg0: i32) -> (i32, i32) {
    %c0_i32 = arith.constant 0 : i32
    %c0_i32_0 = arith.constant 0 : i32
    %c0_i32_1 = arith.constant 0 : i32
    return %c0_i32, %c0_i32_0 : i32, i32
  }
  func.func @transform_2(%arg0: i32) -> (i32, i32) {
    %c0_i32 = arith.constant 0 : i32
    %c0_i32_0 = arith.constant 0 : i32
    %c0_i32_1 = arith.constant 0 : i32
    return %c0_i32, %c0_i32_0 : i32, i32
  }
  func.func @transform_3(%arg0: i32) -> (i32, i32) {
    %c0_i32 = arith.constant 0 : i32
    %c0_i32_0 = arith.constant 0 : i32
    %c0_i32_1 = arith.constant 0 : i32
    return %c0_i32, %c0_i32_0 : i32, i32
  }
  func.func @transform_4(%arg0: i32) -> (i32, i32) {
    %c0_i32 = arith.constant 0 : i32
    %c0_i32_0 = arith.constant 0 : i32
    %c0_i32_1 = arith.constant 0 : i32
    return %c0_i32, %c0_i32_0 : i32, i32
  }
  func.func @transform_5(%arg0: i32) -> (i32, i32) {
    %c0_i32 = arith.constant 0 : i32
    %c0_i32_0 = arith.constant 0 : i32
    %c0_i32_1 = arith.constant 0 : i32
    return %c0_i32, %c0_i32_0 : i32, i32
  }
  func.func @transform_6(%arg0: i32) -> (i32, i32) {
    %c0_i32 = arith.constant 0 : i32
    %c0_i32_0 = arith.constant 0 : i32
    %c0_i32_1 = arith.constant 0 : i32
    return %c0_i32, %c0_i32_0 : i32, i32
  }
  func.func @transform_7(%arg0: i32) -> (i32, i32) {
    %c0_i32 = arith.constant 0 : i32
    %c0_i32_0 = arith.constant 0 : i32
    %c0_i32_1 = arith.constant 0 : i32
    return %c0_i32, %c0_i32_0 : i32, i32
  }
  func.func @transform_8(%arg0: i32) -> (i32, i32) {
    %c0_i32 = arith.constant 0 : i32
    %c0_i32_0 = arith.constant 0 : i32
    %c0_i32_1 = arith.constant 0 : i32
    return %c0_i32, %c0_i32_0 : i32, i32
  }
  func.func @transform_9(%arg0: i32) -> (i32, i32, i32) {
    %c0_i32 = arith.constant 0 : i32
    %c0_i32_0 = arith.constant 0 : i32
    %c0_i32_1 = arith.constant 0 : i32
    return %arg0, %c0_i32, %c0_i32_0 : i32, i32, i32
  }
}

</mosaic_0001>

<bundles_post_ra>
// kernel: tpu_custom_call.1
= control target key start
LH: loop header
LB: loop body
LE: loop exit
PB: predicated region body
PF: predicated region fallthrough
CT: control target
= control target key end

     0   :  { %14 = vsyncpa [#allocation4], 0  ;;  %s1191_s0 = inlined_call_operand.vmem [shape: f32[2,8,128], index: 0, kind: input, shape index: {}]   ;;  %s1192_s1 = inlined_call_operand.hbm [shape: bf16[384,128], index: 1, kind: input, shape index: {}]   ;;  %s1193_s2 = inlined_call_operand.vmem [shape: f32[1,128], index: 2, kind: input, shape index: {}]   ;;  %s1194_s3 = inlined_call_operand.vmem [shape: f32[1,128], index: 3, kind: input, shape index: {}]   ;;  %s1195_s4 = inlined_call_operand.hbm [shape: bf16[384,128], index: 4, kind: input, shape index: {}]   ;;  %s1196_s5 = inlined_call_operand.vmem [shape: f32[1,128], index: 5, kind: input, shape index: {}]   ;;  %s1197_s6 = inlined_call_operand.vmem [shape: f32[1,128], index: 6, kind: input, shape index: {}]   ;;  %s1198_s7 = inlined_call_operand.vmem [shape: f32[128,2], index: 7, kind: input, shape index: {}]   ;;  %s1199_s8 = inlined_call_operand.vmem [shape: f32[2,128], index: 8, kind: input, shape index: {}]   ;;  %s1200_s9 = inlined_call_operand.hbm [shape: f32[2,8,128], index: 9, kind: output, shape index: {}]  }
   0x1   :  { %15 = vsyncpa [#allocation7], 0 }
   0x2   :  { %16 = vsyncpa [#allocation5], 0  ;;  %s23_s11 = sshll.u32 %s1192_s1, 4  ;;  %s1045_s12 = smov [#allocation3]   ;;  %s24_s11 = int_to_ptr.hbm [resolvable:$true] %s23_s11 }
   0x3   :  { %s25_s13 = sshll.u32 %s1045_s12, 4  ;;  %s40_s16 = sshll.u32 %s1195_s4, 4  ;;  %s26_s13 = int_to_ptr.vmem [resolvable:$true] %s25_s13  ;;  %s41_s16 = int_to_ptr.hbm [resolvable:$true] %s40_s16 }
   0x4   :  { %s1046_s17 = smov 64   ;;  %s1047_s18 = smov 4  }
   0x5   :  { %31 = dma.hbm_to_vmem [thread:$0]  %s24_s11, 3072, %s26_s13, [#allocation4], %s1046_s17, %s1046_s17, %s1047_s18  }
   0x6   :  { %s1048_s19 = smov [#allocation6]  }
   0x7   :  { %s42_s20 = sshll.u32 %s1048_s19, 4  ;;  %s43_s20 = int_to_ptr.vmem [resolvable:$true] %s42_s20 }
   0x8   :  { %48 = dma.hbm_to_vmem [thread:$0]  %s41_s16, 3072, %s43_s20, [#allocation7], %s1046_s17, %s1046_s17, %s1047_s18  }
   0x9   :  { %1039 = dma.done.wait [#allocation4], 3072  }
   0xa   :  { %1040 = vsyncadd [#allocation4], 4294964224 }
   0xb   :  { %1041 = dma.done.wait [#allocation7], 3072  }
   0xc   :  { %1042 = vsyncadd [#allocation7], 4294964224  ;;  %v1049_v0 = vmov 0.0   ;;  %v910_v1 = vld [vmem:[#allocation3 + $0x38] sm:$0xff]  ;;  %v909_v4 = vld [vmem:[#allocation3 + $0x30] sm:$0xff]  ;;  %vm646_vm0 = vcmask 1041408  }
   0xd   :  { %67 = vst [vmem:[#allocation2] sm:$0x1] %v1049_v0  ;;  %v918_v2 = vld [vmem:[#allocation3 + $0x78] sm:$0xff]  ;;  %274 = vmatpush.bf16.msra.mxu0 %v910_v1  ;;  %v917_v5 = vld [vmem:[#allocation3 + $0x70] sm:$0xff]  ;;  %v908_v7 = vld [vmem:[#allocation3 + $0x28] sm:$0xff]  ;;  %vm617_vm1 = vcmask 1041409  }
   0xe   :  { %68 = vst [vmem:[#allocation2 + $0x10] sm:$0x1] %v1049_v0  ;;  %v926_v3 = vld [vmem:[#allocation3 + $0xb8] sm:$0xff]  ;;  %288 = vmatpush.bf16.msra.mxu1 %v918_v2  ;;  %v925_v6 = vld [vmem:[#allocation3 + $0xb0] sm:$0xff]  ;;  %v916_v8 = vld [vmem:[#allocation3 + $0x68] sm:$0xff]  ;;  %vm642_vm2 = vcmask 15360  }
   0xf   :  { %69 = vst [vmem:[#allocation2 + $0x9] sm:$0x1] %v1049_v0  ;;  %302 = vmatpush.bf16.msra.mxu2 %v926_v3  ;;  %v924_v9 = vld [vmem:[#allocation3 + $0xa8] sm:$0xff]  ;;  %v1112_v10 = vld [vmem:[%s1191_s0] sm:$0xff]  ;;  %v906_v15 = vld [vmem:[#allocation3 + $0x18] sm:$0xff]  ;;  %s695_s15 = sshll.u32 %s1200_s9, 4  ;;  %s696_s15 = int_to_ptr.hbm [resolvable:$true] %s695_s15 }
  0x10   :  { %70 = vst [vmem:[#allocation2 + $0x19] sm:$0x1] %v1049_v0  ;;  %v1117_v11 = vld [vmem:[%s1191_s0 + $0x8] sm:$0xff]  ;;  %v907_v12 = vld [vmem:[#allocation3 + $0x20] sm:$0xff]  ;;  %v914_v16 = vld [vmem:[#allocation3 + $0x58] sm:$0xff]  ;;  %s1051_s16 = smov 128  }
  0x11   :  { %275 = vmatpush.bf16.msra.mxu0 %v909_v4  ;;  %71 = vst [vmem:[#allocation2 + $0x1] sm:$0xff] %v1112_v10  ;;  %v915_v13 = vld [vmem:[#allocation3 + $0x60] sm:$0xff]  ;;  %v922_v17 = vld [vmem:[#allocation3 + $0x98] sm:$0xff]  ;;  %v905_v18 = vld [vmem:[#allocation3 + $0x10] sm:$0xff]  ;;  %v80_v32 = vpack.c.bf16 %v1117_v11, %v1112_v10  ;;  %s1052_s17 = smov 8  }
  0x12   :  { %289 = vmatpush.bf16.msra.mxu1 %v917_v5  ;;  %72 = vst [vmem:[#allocation2 + $0x11] sm:$0xff] %v1117_v11  ;;  %v923_v14 = vld [vmem:[#allocation3 + $0xa0] sm:$0xff]  ;;  %v913_v19 = vld [vmem:[#allocation3 + $0x50] sm:$0xff]  ;;  %v904_v21 = vld [vmem:[#allocation3 + $0x8] sm:$0xff] }
  0x13   :  { %303 = vmatpush.bf16.msra.mxu2 %v925_v6  ;;  %v921_v20 = vld [vmem:[#allocation3 + $0x90] sm:$0xff]  ;;  %v912_v22 = vld [vmem:[#allocation3 + $0x48] sm:$0xff]  ;;  %v903_v24 = vld [vmem:[#allocation3] sm:$0xff] }
  0x14   :  { %v920_v23 = vld [vmem:[#allocation3 + $0x88] sm:$0xff]  ;;  %v911_v25 = vld [vmem:[#allocation3 + $0x40] sm:$0xff]  ;;  %v942_v34 = vld [vmem:[#allocation6 + $0x78] sm:$0xff] }
  0x15   :  { %276 = vmatpush.bf16.msra.mxu0 %v908_v7  ;;  %v919_v28 = vld [vmem:[#allocation3 + $0x80] sm:$0xff]  ;;  %v941_v35 = vld [vmem:[#allocation6 + $0x70] sm:$0xff]  ;;  %v934_v36 = vld [vmem:[#allocation6 + $0x38] sm:$0xff] }
  0x16   :  { %290 = vmatpush.bf16.msra.mxu1 %v916_v8  ;;  %v950_v37 = vld [vmem:[#allocation6 + $0xb8] sm:$0xff]  ;;  %v940_v38 = vld [vmem:[#allocation6 + $0x68] sm:$0xff]  ;;  %533 = vmatpush.bf16.msra.mxu3 %v934_v36  ;;  %v933_v39 = vld [vmem:[#allocation6 + $0x30] sm:$0xff] }
  0x17   :  { %304 = vmatpush.bf16.msra.mxu2 %v924_v9  ;;  %v949_v40 = vld [vmem:[#allocation6 + $0xb0] sm:$0xff]  ;;  %v939_v41 = vld [vmem:[#allocation6 + $0x60] sm:$0xff]  ;;  %v932_v42 = vld [vmem:[#allocation6 + $0x28] sm:$0xff] }
  0x18   :  { %v73_v26 = vld [vmem:[#allocation2] sm:$0xff]  ;;  %v948_v43 = vld [vmem:[#allocation6 + $0xa8] sm:$0xff]  ;;  %v938_v44 = vld [vmem:[#allocation6 + $0x58] sm:$0xff] }
  0x19   :  { %277 = vmatpush.bf16.msra.mxu0 %v907_v12  ;;  %v74_v27 = vld [vmem:[#allocation2 + $0x10] sm:$0xff]  ;;  %v77_v29 = vld [vmem:[#allocation2 + $0x2] sm:$0xff]  ;;  %v930_v48 = vld [vmem:[#allocation6 + $0x18] sm:$0xff] }
  0x1a   :  { %291 = vmatpush.bf16.msra.mxu1 %v915_v13  ;;  %v78_v30 = vld [vmem:[#allocation2 + $0x12] sm:$0xff]  ;;  %v79_v31 = vpack.c.bf16 %v74_v27, %v73_v26  ;;  %534 = vmatpush.bf16.msra.mxu3 %v933_v39  ;;  %v931_v45 = vld [vmem:[#allocation6 + $0x20] sm:$0xff]  ;;  %v936_v50 = vld [vmem:[#allocation6 + $0x48] sm:$0xff] }
  0x1b   :  { %305 = vmatpush.bf16.msra.mxu2 %v923_v14  ;;  %v81_v33 = vpack.c.bf16 %v78_v30, %v77_v29  ;;  %v947_v46 = vld [vmem:[#allocation6 + $0xa0] sm:$0xff]  ;;  %v937_v47 = vld [vmem:[#allocation6 + $0x50] sm:$0xff]  ;;  %v946_v49 = vld [vmem:[#allocation6 + $0x98] sm:$0xff] }
  0x1c   :  { %v929_v51 = vld [vmem:[#allocation6 + $0x10] sm:$0xff]  ;;  %v935_v53 = vld [vmem:[#allocation6 + $0x40] sm:$0xff]  ;;  %v928_v54 = vld [vmem:[#allocation6 + $0x8] sm:$0xff] }
  0x1d   :  { %278 = vmatpush.bf16.msra.mxu0 %v906_v15  ;;  %v945_v52 = vld [vmem:[#allocation6 + $0x90] sm:$0xff]  ;;  %v944_v55 = vld [vmem:[#allocation6 + $0x88] sm:$0xff]  ;;  %v927_v56 = vld [vmem:[#allocation6] sm:$0xff] }
  0x1e   :  { %292 = vmatpush.bf16.msra.mxu1 %v914_v16  ;;  %535 = vmatpush.bf16.msra.mxu3 %v932_v42  ;;  %v943_v57 = vld [vmem:[#allocation6 + $0x80] sm:$0xff]  ;;  %v609_v26 = vld [vmem:[%s1198_s7 + $0x50] sm:$0xff]  ;;  %v608_v27 = vld [vmem:[%s1198_s7 + $0x48] sm:$0xff] }
  0x1f   :  { %306 = vmatpush.bf16.msra.mxu2 %v922_v17  ;;  %v959_v61 = vld [vmem:[%s1193_s2] ss:$0 sm:$0xff]  ;;  %v606_v29 = vld [vmem:[%s1198_s7 + $0x38] sm:$0xff]  ;;  %v605_v30 = vld [vmem:[%s1198_s7 + $0x30] sm:$0xff] }
  0x20   :  { %v960_v0 = vld [vmem:[%s1194_s3] ss:$0 sm:$0xff] }
  0x21   :  { %279 = vmatpush.bf16.msra.mxu0 %v905_v18  ;;  %v599_v36 = vld [vmem:[%s1198_s7] sm:$0xff] }
  0x22   :  { %293 = vmatpush.bf16.msra.mxu1 %v913_v19  ;;  %536 = vmatpush.bf16.msra.mxu3 %v931_v45  ;;  %v961_v42 = vld [vmem:[%s1196_s5] ss:$0 sm:$0xff]  ;;  %s1050_s5 = smov [#allocation8]  }
  0x23   :  { %307 = vmatpush.bf16.msra.mxu2 %v921_v20 }
  0x25   :  { %280 = vmatpush.bf16.msra.mxu0 %v904_v21  ;;  %v614_v21 = vld [vmem:[%s1198_s7 + $0x78] sm:$0xff] }
  0x26   :  { %294 = vmatpush.bf16.msra.mxu1 %v912_v22  ;;  %537 = vmatpush.bf16.msra.mxu3 %v930_v48  ;;  %v613_v22 = vld [vmem:[%s1198_s7 + $0x70] sm:$0xff] }
  0x27   :  { %308 = vmatpush.bf16.msra.mxu2 %v920_v23  ;;  %v612_v23 = vld [vmem:[%s1198_s7 + $0x68] sm:$0xff] }
  0x29   :  { %281 = vmatpush.bf16.msra.mxu0 %v903_v24  ;;  %v611_v24 = vld [vmem:[%s1198_s7 + $0x60] sm:$0xff] }
  0x2a   :  { %295 = vmatpush.bf16.msra.mxu1 %v911_v25  ;;  %538 = vmatpush.bf16.msra.mxu3 %v929_v51  ;;  %v610_v25 = vld [vmem:[%s1198_s7 + $0x58] sm:$0xff] }
  0x2b   :  { %309 = vmatpush.bf16.msra.mxu2 %v919_v28  ;;  %v607_v28 = vld [vmem:[%s1198_s7 + $0x40] sm:$0xff] }
  0x2c   :  { %282 = vmatmul.bf16.vlgmr.msra.gmra.mxu0 %v79_v31  ;;  %v604_v31 = vld [vmem:[%s1198_s7 + $0x28] sm:$0xff] }
  0x2d   :  { %296 = vmatmul.bf16.vlgmr.msra.gmra.mxu1 %v80_v32  ;;  %547 = vmatpush.bf16.msrb.mxu0 %v942_v34  ;;  %v603_v32 = vld [vmem:[%s1198_s7 + $0x20] sm:$0xff]  ;;  %v601_v34 = vld [vmem:[%s1198_s7 + $0x10] sm:$0xff] }
  0x2e   :  { %310 = vmatmul.bf16.vlgmr.msra.gmra.mxu2 %v81_v33  ;;  %561 = vmatpush.bf16.msrb.mxu1 %v950_v37  ;;  %v602_v33 = vld [vmem:[%s1198_s7 + $0x18] sm:$0xff] }
  0x2f   :  { %539 = vmatpush.bf16.msra.mxu3 %v928_v54  ;;  %620 = vmatpush.msrb.mxu2 %v614_v21 }
  0x31   :  { %548 = vmatpush.bf16.msrb.mxu0 %v941_v35  ;;  %621 = vmatpush.msrb.mxu2 %v613_v22  ;;  %v600_v35 = vld [vmem:[%s1198_s7 + $0x8] sm:$0xff] }
  0x32   :  { %562 = vmatpush.bf16.msrb.mxu1 %v949_v40 }
  0x33   :  { %540 = vmatpush.bf16.msra.mxu3 %v927_v56  ;;  %622 = vmatpush.msrb.mxu2 %v612_v23 }
  0x35   :  { %549 = vmatpush.bf16.msrb.mxu0 %v940_v38  ;;  %623 = vmatpush.msrb.mxu2 %v611_v24  ;;  %v641_v38 = vld [vmem:[%s1199_s8] sm:$0x3] }
  0x36   :  { %563 = vmatpush.bf16.msrb.mxu1 %v948_v43 }
  0x37   :  { %624 = vmatpush.msrb.mxu2 %v610_v25  ;;  %901 = vmatpush.msk.msrb.mxu3 %vm646_vm0, %v641_v38 }
  0x39   :  { %550 = vmatpush.bf16.msrb.mxu0 %v939_v41  ;;  %625 = vmatpush.msrb.mxu2 %v609_v26 }
  0x3a   :  { %564 = vmatpush.bf16.msrb.mxu1 %v947_v46 }
  0x3b   :  { %626 = vmatpush.msrb.mxu2 %v608_v27 }
  0x3d   :  { %551 = vmatpush.bf16.msrb.mxu0 %v938_v44  ;;  %627 = vmatpush.msrb.mxu2 %v607_v28  ;;  %v962_v44 = vld [vmem:[%s1197_s6] ss:$0 sm:$0xff]  ;;  %s693_s6 = sshll.u32 %s1050_s5, 4  ;;  %s694_s6 = int_to_ptr.vmem [resolvable:$true] %s693_s6 }
  0x3e   :  { %565 = vmatpush.bf16.msrb.mxu1 %v946_v49 }
  0x3f   :  { %628 = vmatpush.msrb.mxu2 %v606_v29 }
  0x41   :  { %552 = vmatpush.bf16.msrb.mxu0 %v937_v47  ;;  %629 = vmatpush.msrb.mxu2 %v605_v30 }
  0x42   :  { %566 = vmatpush.bf16.msrb.mxu1 %v945_v52 }
  0x43   :  { %630 = vmatpush.msrb.mxu2 %v604_v31 }
  0x45   :  { %553 = vmatpush.bf16.msrb.mxu0 %v936_v50  ;;  %631 = vmatpush.msrb.mxu2 %v603_v32 }
  0x46   :  { %567 = vmatpush.bf16.msrb.mxu1 %v944_v55 }
  0x47   :  { %632 = vmatpush.msrb.mxu2 %v602_v33 }
  0x49   :  { %554 = vmatpush.bf16.msrb.mxu0 %v935_v53  ;;  %633 = vmatpush.msrb.mxu2 %v601_v34 }
  0x4a   :  { %568 = vmatpush.bf16.msrb.mxu1 %v943_v57 }
  0x4b   :  { %634 = vmatpush.msrb.mxu2 %v600_v35 }
  0x4d   :  { %635 = vmatpush.msrb.mxu2 %v599_v36 }
  0xa9   :  { %v283_v58 = vpop.f32.mrf.mxu0 }
  0xaa   :  { %v297_v59 = vpop.f32.mrf.mxu1 }
  0xab   :  { %v298_v60 = vadd.f32 %v297_v59, %v283_v58 }
  0xb1   :  { %v311_v62 = vpop.f32.mrf.mxu2  ;;  %v285_v2 = vpop.f32.mrf.mxu0 }
  0xb2   :  { %v312_v63 = vadd.f32 %v311_v62, %v298_v60  ;;  %v299_v3 = vpop.f32.mrf.mxu1 }
  0xb3   :  { %v300_v6 = vadd.f32 %v299_v3, %v285_v2 }
  0xb4   :  { %v320_v1 = vmul.f32 %v959_v61, %v312_v63 }
  0xb6   :  { %v326_v4 = vadd.f32 %v960_v0, %v320_v1 }
  0xb8   :  { %v328_v5 = vmax.f32 %v326_v4, 0.0 }
  0xb9   :  { %v313_v7 = vpop.f32.mrf.mxu2 }
  0xba   :  { %330 = vst [vmem:[#allocation2 + $0x1] sm:$0xff] %v328_v5  ;;  %v314_v8 = vadd.f32 %v313_v7, %v300_v6 }
  0xbc   :  { %v321_v9 = vmul.f32 %v959_v61, %v314_v8 }
  0xbe   :  { %v327_v12 = vadd.f32 %v960_v0, %v321_v9 }
  0xc0   :  { %v329_v13 = vmax.f32 %v327_v12, 0.0 }
  0xc1   :  { %v332_v15 = vld [vmem:[#allocation2] sm:$0xff] }
  0xc2   :  { %331 = vst [vmem:[#allocation2 + $0x11] sm:$0xff] %v329_v13  ;;  %v339_v14 = vpack.c.bf16 %v329_v13, %v328_v5  ;;  %v336_v17 = vld [vmem:[#allocation2 + $0x2] sm:$0xff] }
  0xc4   :  { %555 = vmatmul.bf16.vlgmr.msrb.gmra.mxu0 %v339_v14 }
  0xc9   :  { %v333_v16 = vld [vmem:[#allocation2 + $0x10] sm:$0xff] }
  0xca   :  { %v337_v18 = vld [vmem:[#allocation2 + $0x12] sm:$0xff]  ;;  %v338_v19 = vpack.c.bf16 %v333_v16, %v332_v15 }
  0xcb   :  { %v340_v20 = vpack.c.bf16 %v337_v18, %v336_v17 }
  0xcc   :  { %541 = vmatmul.bf16.vlgmr.msra.gmra.mxu3 %v338_v19 }
  0xcd   :  { %569 = vmatmul.bf16.vlgmr.msrb.gmra.mxu1 %v340_v20 }
 0x141   :  { %v556_v37 = vpop.f32.mrf.mxu0 }
 0x149   :  { %v558_v47 = vpop.f32.mrf.mxu0 }
 0x14a   :  { %v570_v39 = vpop.f32.mrf.mxu1 }
 0x14f   :  { %v542_v40 = vpop.f32.mrf.mxu3 }
 0x150   :  { %v557_v41 = vadd.f32 %v556_v37, %v542_v40 }
 0x152   :  { %v571_v43 = vadd.f32 %v570_v39, %v557_v41  ;;  %v572_v51 = vpop.f32.mrf.mxu1 }
 0x154   :  { %v579_v45 = vmul.f32 %v961_v42, %v571_v43 }
 0x156   :  { %v585_v46 = vadd.f32 %v962_v44, %v579_v45 }
 0x157   :  { %v544_v48 = vpop.f32.mrf.mxu3 }
 0x158   :  { %v587_v49 = vrot.slane %v585_v46, 4  ;;  %v559_v50 = vadd.f32 %v558_v47, %v544_v48 }
 0x15a   :  { %v573_v52 = vadd.f32 %v572_v51, %v559_v50  ;;  %v588_v53 = vadd.f32 %v587_v49, %v585_v46 }
 0x15c   :  { %v580_v54 = vmul.f32 %v961_v42, %v573_v52  ;;  %v589_v56 = vrot.slane %v588_v53, 2 }
 0x15e   :  { %v586_v55 = vadd.f32 %v962_v44, %v580_v54  ;;  %v590_v58 = vadd.f32 %v589_v56, %v588_v53 }
 0x160   :  { %v593_v57 = vrot.slane %v586_v55, 4  ;;  %v591_v61 = vrot.slane %v590_v58, 1 }
 0x162   :  { %v594_v59 = vadd.f32 %v593_v57, %v586_v55  ;;  %v592_v0 = vadd.f32 %v591_v61, %v590_v58 }
 0x164   :  { %v595_v60 = vrot.slane %v594_v59, 2 }
 0x166   :  { %v596_v62 = vadd.f32 %v595_v60, %v594_v59 }
 0x168   :  { %v597_v63 = vrot.slane %v596_v62, 1 }
 0x16a   :  { %v598_v1 = vadd.f32 %v597_v63, %v596_v62 }
 0x16c   :  { %v618_v2 = vsel %vm617_vm1, %v598_v1, %v592_v0 }
 0x16d   :  { %636 = vmatmul.f32.vlgmr.msrb.gmra.mxu2 %v618_v2 }
 0x1f0   :  { %v637_v3 = vpop.f32.mrf.mxu2 }
 0x1f1   :  { %v640_v4 = vmax.f32 %v637_v3, 0.0 }
 0x1f3   :  { %902 = vmatmul.msk.f32.vlgmr.msrb.gmra.mxu3 %vm642_vm2, %v640_v4 }
 0x276   :  { %v667_v5 = vpop.f32.mrf.mxu3 }
 0x277   :  { %v670_v6 = vsub.f32 0.0, %v667_v5 }
 0x279   :  { %v671_v7 = vmul.f32 1.442695, %v670_v6 }
 0x27b   :  { %963 = vpow2.f32 %v671_v7 }
 0x281   :  { %v964_v8 = vpop.eup %963 }
 0x282   :  { %v673_v9 = vadd.f32 1.0, %v964_v8 }
 0x284   :  { %965 = vrcp.f32 %v673_v9 }
 0x28a   :  { %v966_v12 = vpop.eup %965 }
 0x28b   :  { %v676_v13 = vrot.slane %v966_v12, 1  ;;  %v677_v14 = vperm.slane %v966_v12, 0 }
 0x28d   :  { %v678_v15 = vperm.slane %v676_v13, 0  ;;  %v681_v16 = vmul.f32 %v677_v14, %v585_v46 }
 0x28f   :  { %v682_v17 = vmul.f32 %v678_v15, %v586_v55  ;;  %v683_v18 = vadd.f32 %v681_v16, %v1112_v10 }
 0x291   :  { %v684_v19 = vadd.f32 %v682_v17, %v1117_v11  ;;  %v685_v20 = vmax.f32 %v683_v18, 0.0 }
 0x293   :  { %v686_v21 = vmax.f32 %v684_v19, 0.0  ;;  %687 = vst [vmem:[#allocation8] sm:$0xff] %v685_v20 }
 0x295   :  { %688 = vst [vmem:[#allocation8 + $0x8] sm:$0xff] %v686_v21 }
 0x296   :  { %701 = dma.vmem_to_hbm [thread:$0]  %s694_s6, 256, %s696_s15, [#allocation5], %s1051_s16, %s1051_s16, %s1052_s17  }
 0x297   :  { %1043 = dma.done.wait [#allocation5], 256  }
 0x298   :  { %1044 = vsyncadd [#allocation5], 4294967040 }
 0x299   :  { %706 = vsyncpa [#allocation4], 1 }
 0x29a   :  { %707 = vsyncpa [#allocation7], 1 }
 0x29b   :  { %708 = vsyncpa [#allocation5], 1 }

</bundles_post_ra>
